<compile_context>
chip_gen: v5e
topology: v5e:2x2
jax: 0.10.0
libtpu: 0.0.40
codegen_flags: <defaults>
</compile_context>

<pallas_src>
import functools

import jax
import jax.numpy as jnp
from jax.experimental import pallas as pl
from jax.experimental.pallas import tpu as pltpu


def _wce_kernel(logits_ref, tgt_ref, wcls_ref, out_ref, acc_ref, *,
                total_n, tile_n):
    p = pl.program_id(0)                 # part (megacore) axis
    i = pl.program_id(1)                 # row-tile axis (reduction)
    steps = pl.num_programs(1)

    @pl.when(i == 0)
    def _():
        acc_ref[...] = jnp.zeros_like(acc_ref)

    logits = logits_ref[...].astype(jnp.float32)        # (T, C)
    tgt = tgt_ref[...]                                  # (T, 1) int32
    wcls = wcls_ref[...].astype(jnp.float32)            # (1, C)

    t, c = logits.shape
    cls_iota = jax.lax.broadcasted_iota(jnp.int32, (t, c), 1)
    one_hot = (cls_iota == tgt).astype(jnp.float32)     # (T, C)

    # numerically-stable per-row cross entropy: logsumexp(l) - l[target]
    m = jnp.max(logits, axis=-1, keepdims=True)
    lse = m + jnp.log(jnp.sum(jnp.exp(logits - m), axis=-1, keepdims=True))
    picked = jnp.sum(one_hot * logits, axis=-1, keepdims=True)
    loss = lse - picked                                  # (T, 1)

    # per-sample weight = w_class[target_i], gathered via the same one-hot
    w = jnp.sum(one_hot * wcls, axis=-1, keepdims=True)  # (T, 1)

    # mask rows that are padding (global row index >= total_n)
    blk = p * steps + i
    row = blk * tile_n + jax.lax.broadcasted_iota(jnp.int32, (t, 1), 0)
    valid = (row < total_n).astype(jnp.float32)          # (T, 1)

    # deferred reduction: elementwise accumulate per-row contributions
    acc_ref[...] = acc_ref[...] + loss * w * valid

    @pl.when(i == steps - 1)
    def _():
        partial = jnp.sum(acc_ref[...])                  # single final reduce
        r = jax.lax.broadcasted_iota(jnp.int32, out_ref.shape, 0)
        l = jax.lax.broadcasted_iota(jnp.int32, out_ref.shape, 1)
        out_ref[...] = jnp.where((r == 0) & (l == 0), partial,
                                 jnp.float32(0.0)).astype(out_ref.dtype)


def _choose_tile_n(n, c, itemsize, num_parts, budget_bytes=4 << 20):
    """Largest row tile whose logits slab fits the per-buffer VMEM budget."""
    t = max(budget_bytes // max(c * itemsize, 1), 16)
    t = min(t, 8192)
    t = max((t // 16) * 16, 16)          # multiple of 16 (safe for f32 & bf16)
    # do not over-pad tiny inputs
    per_part = -(-n // num_parts)
    t = min(t, max(((per_part + 15) // 16) * 16, 16))
    return t


def weighted_by_class_cross_entropy_loss(logits, target):
    """logits: (N, C) float, target: (N,) int. Returns scalar float32."""
    n, c = logits.shape
    itemsize = jnp.dtype(logits.dtype).itemsize

    # --- glue: per-class weights (tiny, O(C)) -----------------------------
    counts = jnp.zeros((c,), jnp.float32).at[target].add(1.0)
    n_actual = jnp.sum(counts > 0).astype(jnp.float32)
    w_class = (counts.sum() / (n_actual * jnp.clip(counts, 1.0, None))
               * jnp.clip(counts, 0.0, 1.0))

    # --- tiling / padding --------------------------------------------------
    num_parts = 2                                  # megacore split on v7x; serial elsewhere
    tile_n = _choose_tile_n(n, c, itemsize, num_parts)
    steps_per_part = -(-(-(-n // num_parts)) // tile_n)
    n_pad = num_parts * steps_per_part * tile_n

    pad = n_pad - n
    logits_p = jnp.pad(logits, ((0, pad), (0, 0))) if pad else logits
    tgt2d = target.astype(jnp.int32).reshape(n, 1)
    tgt2d = jnp.pad(tgt2d, ((0, pad), (0, 0))) if pad else tgt2d
    wcls2d = w_class.astype(jnp.float32).reshape(1, c)

    grid = (num_parts, steps_per_part)
    kernel = functools.partial(_wce_kernel, total_n=n, tile_n=tile_n)

    row_map = lambda p, i: (p * steps_per_part + i, 0)

    cost = pl.CostEstimate(
        flops=int(6 * n * c),
        transcendentals=int(n * c + n),
        bytes_accessed=int(n_pad * c * itemsize + n_pad * 4 + c * 4
                           + num_parts * 8 * 128 * 4),
    )

    out = pl.pallas_call(
        kernel,
        out_shape=jax.ShapeDtypeStruct((num_parts * 8, 128), jnp.float32),
        grid_spec=pltpu.PrefetchScalarGridSpec(
            num_scalar_prefetch=0,
            grid=grid,
            in_specs=[
                pl.BlockSpec((tile_n, c), row_map),          # logits tile
                pl.BlockSpec((tile_n, 1), row_map),          # targets tile
                pl.BlockSpec((1, c), lambda p, i: (0, 0)),   # class weights
            ],
            out_specs=pl.BlockSpec((8, 128), lambda p, i: (p, 0)),
            scratch_shapes=[pltpu.VMEM((tile_n, 1), jnp.float32)],
        ),
        compiler_params=pltpu.CompilerParams(
            dimension_semantics=("parallel", "arbitrary"),
            vmem_limit_bytes=48 * 1024 * 1024,
        ),
        cost_estimate=cost,
    )(logits_p, tgt2d, wcls2d)

    # only element [0,0] of each per-part (8,128) block is non-zero
    return jnp.sum(out) / jnp.float32(n)


def _reference(logits, target):
    n, c = logits.shape
    counts = jnp.zeros((c,), jnp.float32).at[target].add(1.0)
    n_actual = jnp.sum(counts > 0).astype(jnp.float32)
    w_class = (counts.sum() / (n_actual * jnp.clip(counts, 1.0, None))
               * jnp.clip(counts, 0.0, 1.0))
    logits = logits.astype(jnp.float32)
    lse = jax.scipy.special.logsumexp(logits, axis=-1)
    picked = jnp.take_along_axis(logits, target[:, None], axis=-1)[:, 0]
    loss = lse - picked
    return jnp.mean(loss * w_class[target])


if __name__ == "__main__":
    key = jax.random.PRNGKey(0)
    k1, k2 = jax.random.split(key)

    N, C = 32, 8  # batch of 32 samples, 8 classes
    logits = jax.random.normal(k1, (N, C), dtype=jnp.float32)
    # leave some classes unused so the "actual classes" path is exercised
    target = jax.random.randint(k2, (N,), 0, C - 2, dtype=jnp.int32)

    out = weighted_by_class_cross_entropy_loss(logits, target)
    out = jax.block_until_ready(out)

    ref = jax.block_until_ready(_reference(logits, target))
    assert jnp.allclose(out, ref, rtol=1e-5, atol=1e-5), (out, ref)

    # also exercise a non-divisible / padded N to check the masking path
    N2 = 37
    logits2 = jax.random.normal(k1, (N2, C), dtype=jnp.float32)
    target2 = jax.random.randint(k2, (N2,), 0, C, dtype=jnp.int32)
    out2 = jax.block_until_ready(
        weighted_by_class_cross_entropy_loss(logits2, target2))
    ref2 = jax.block_until_ready(_reference(logits2, target2))
    assert jnp.allclose(out2, ref2, rtol=1e-5, atol=1e-5), (out2, ref2)

    print("KERNEL_OK")
</pallas_src>

<mosaic_0001>
module attributes {stable_mosaic.version = 11 : i64} {
  func.func @_wce_kernel(%arg0: i32, %arg1: i32, %arg2: memref<16x8xf32, #tpu.memory_space<vmem>>, %arg3: memref<16x1xi32, #tpu.memory_space<vmem>>, %arg4: memref<1x8xf32, #tpu.memory_space<vmem>>, %arg5: memref<8x128xf32, #tpu.memory_space<vmem>>, %arg6: memref<16x1xf32, #tpu.memory_space<vmem>>) attributes {dimension_semantics = [#tpu.dimension_semantics<parallel>, #tpu.dimension_semantics<arbitrary>], iteration_bounds = array<i64: 2, 1>, scalar_prefetch = 0 : i64, scratch_operands = 1 : i64, tpu.core_type = #tpu.core_type<tc>, window_params = [{transform_indices = @transform_0, window_bounds = array<i64: 16, 8>}, {transform_indices = @transform_1, window_bounds = array<i64: 16, 1>}, {pipeline_mode = #tpu.pipeline_mode<synchronous>, transform_indices = @transform_2, window_bounds = array<i64: 1, 8>}, {transform_indices = @transform_3, window_bounds = array<i64: 8, 128>}]} {
    %c0_i32 = arith.constant 0 : i32
    %0 = arith.cmpi eq, %arg1, %c0_i32 : i32
    %1 = arith.extui %0 : i1 to i32
    %c0_i32_0 = arith.constant 0 : i32
    %2 = arith.cmpi ne, %1, %c0_i32_0 : i32
    scf.if %2 {
      %cst_15 = arith.constant 0.000000e+00 : f32
      %46 = vector.broadcast %cst_15 : f32 to vector<16x1xf32>
      %c0_16 = arith.constant 0 : index
      %c0_17 = arith.constant 0 : index
      %47 = vector.load %arg6[%c0_16, %c0_17] : memref<16x1xf32, #tpu.memory_space<vmem>>, vector<16x1xf32>
      tpu.vector_store %arg6[%c0_16, %c0_17], %46 {strides = array<i32>} : memref<16x1xf32, #tpu.memory_space<vmem>>, vector<16x1xf32>,
    } else {
    }
    %c0 = arith.constant 0 : index
    %c0_1 = arith.constant 0 : index
    %3 = vector.load %arg2[%c0, %c0_1] : memref<16x8xf32, #tpu.memory_space<vmem>>, vector<16x8xf32>
    %c0_2 = arith.constant 0 : index
    %c0_3 = arith.constant 0 : index
    %4 = vector.load %arg3[%c0_2, %c0_3] : memref<16x1xi32, #tpu.memory_space<vmem>>, vector<16x1xi32>
    %c0_4 = arith.constant 0 : index
    %c0_5 = arith.constant 0 : index
    %5 = vector.load %arg4[%c0_4, %c0_5] : memref<1x8xf32, #tpu.memory_space<vmem>>, vector<1x8xf32>
    %6 = tpu.iota {dimensions = array<i32: 1>} : vector<16x8xi32>
    %7 = vector.broadcast %4 : vector<16x1xi32> to vector<16x8xi32>
    %8 = arith.cmpi eq, %6, %7 : vector<16x8xi32>
    %9 = arith.extui %8 : vector<16x8xi1> to vector<16x8xi32>
    %10 = arith.sitofp %9 : vector<16x8xi32> to vector<16x8xf32>
    %cst = arith.constant dense<0xFF800000> : vector<16xf32>
    %11 = vector.multi_reduction <maximumf>, %3, %cst [1] : vector<16x8xf32> to vector<16xf32>
    %12 = vector.shape_cast %11 : vector<16xf32> to vector<16x1xf32>
    %13 = vector.broadcast %12 : vector<16x1xf32> to vector<16x8xf32>
    %14 = arith.subf %3, %13 : vector<16x8xf32>
    %15 = math.exp %14 : vector<16x8xf32>
    %cst_6 = arith.constant dense<0.000000e+00> : vector<16xf32>
    %16 = vector.multi_reduction <add>, %15, %cst_6 [1] : vector<16x8xf32> to vector<16xf32>
    %17 = vector.shape_cast %16 : vector<16xf32> to vector<16x1xf32>
    %18 = math.log %17 : vector<16x1xf32>
    %19 = arith.addf %12, %18 : vector<16x1xf32>
    %20 = arith.mulf %10, %3 : vector<16x8xf32>
    %cst_7 = arith.constant dense<0.000000e+00> : vector<16xf32>
    %21 = vector.multi_reduction <add>, %20, %cst_7 [1] : vector<16x8xf32> to vector<16xf32>
    %22 = vector.shape_cast %21 : vector<16xf32> to vector<16x1xf32>
    %23 = arith.subf %19, %22 : vector<16x1xf32>
    %24 = vector.broadcast %5 : vector<1x8xf32> to vector<16x8xf32>
    %25 = arith.mulf %10, %24 : vector<16x8xf32>
    %cst_8 = arith.constant dense<0.000000e+00> : vector<16xf32>
    %26 = vector.multi_reduction <add>, %25, %cst_8 [1] : vector<16x8xf32> to vector<16xf32>
    %27 = vector.shape_cast %26 : vector<16xf32> to vector<16x1xf32>
    %c1_i32 = arith.constant 1 : i32
    %28 = arith.muli %arg0, %c1_i32 : i32
    %29 = arith.addi %28, %arg1 : i32
    %c16_i32 = arith.constant 16 : i32
    %30 = arith.muli %29, %c16_i32 : i32
    %31 = tpu.iota {dimensions = array<i32: 0>} : vector<16x1xi32>
    %32 = vector.broadcast %30 : i32 to vector<16x1xi32>
    %33 = arith.addi %32, %31 : vector<16x1xi32>
    %c32_i32 = arith.constant 32 : i32
    %34 = vector.broadcast %c32_i32 : i32 to vector<16x1xi32>
    %35 = arith.cmpi slt, %33, %34 : vector<16x1xi32>
    %36 = arith.extui %35 : vector<16x1xi1> to vector<16x1xi32>
    %37 = arith.sitofp %36 : vector<16x1xi32> to vector<16x1xf32>
    %c0_9 = arith.constant 0 : index
    %c0_10 = arith.constant 0 : index
    %38 = vector.load %arg6[%c0_9, %c0_10] : memref<16x1xf32, #tpu.memory_space<vmem>>, vector<16x1xf32>
    %39 = arith.mulf %23, %27 : vector<16x1xf32>
    %40 = arith.mulf %39, %37 : vector<16x1xf32>
    %41 = arith.addf %38, %40 : vector<16x1xf32>
    %c0_11 = arith.constant 0 : index
    %c0_12 = arith.constant 0 : index
    %42 = vector.load %arg6[%c0_11, %c0_12] : memref<16x1xf32, #tpu.memory_space<vmem>>, vector<16x1xf32>
    tpu.vector_store %arg6[%c0_11, %c0_12], %41 {strides = array<i32>} : memref<16x1xf32, #tpu.memory_space<vmem>>, vector<16x1xf32>,
    %c0_i32_13 = arith.constant 0 : i32
    %43 = arith.cmpi eq, %arg1, %c0_i32_13 : i32
    %44 = arith.extui %43 : i1 to i32
    %c0_i32_14 = arith.constant 0 : i32
    %45 = arith.cmpi ne, %44, %c0_i32_14 : i32
    scf.if %45 {
      %c0_15 = arith.constant 0 : index
      %c0_16 = arith.constant 0 : index
      %46 = vector.load %arg6[%c0_15, %c0_16] : memref<16x1xf32, #tpu.memory_space<vmem>>, vector<16x1xf32>
      %47 = vector.shape_cast %46 : vector<16x1xf32> to vector<1x16x1xf32>
      %cst_17 = arith.constant dense<0.000000e+00> : vector<1xf32>
      %48 = vector.multi_reduction <add>, %47, %cst_17 [1, 2] : vector<1x16x1xf32> to vector<1xf32>
      %49 = vector.shape_cast %48 : vector<1xf32> to vector<1x1x1xf32>
      %50 = vector.extract %49[0, 0, 0] : f32 from vector<1x1x1xf32>
      %51 = tpu.iota {dimensions = array<i32: 0>} : vector<8x128xi32>
      %52 = tpu.iota {dimensions = array<i32: 1>} : vector<8x128xi32>
      %c0_i32_18 = arith.constant 0 : i32
      %53 = vector.broadcast %c0_i32_18 : i32 to vector<8x128xi32>
      %54 = arith.cmpi eq, %51, %53 : vector<8x128xi32>
      %c0_i32_19 = arith.constant 0 : i32
      %55 = vector.broadcast %c0_i32_19 : i32 to vector<8x128xi32>
      %56 = arith.cmpi eq, %52, %55 : vector<8x128xi32>
      %57 = arith.andi %54, %56 : vector<8x128xi1>
      %cst_20 = arith.constant 0.000000e+00 : f32
      %58 = vector.broadcast %50 : f32 to vector<8x128xf32>
      %59 = vector.broadcast %cst_20 : f32 to vector<8x128xf32>
      %60 = arith.select %57, %58, %59 : vector<8x128xi1>, vector<8x128xf32>
      %c0_21 = arith.constant 0 : index
      %c0_22 = arith.constant 0 : index
      %61 = vector.load %arg5[%c0_21, %c0_22] : memref<8x128xf32, #tpu.memory_space<vmem>>, vector<8x128xf32>
      tpu.vector_store %arg5[%c0_21, %c0_22], %60 {strides = array<i32>} : memref<8x128xf32, #tpu.memory_space<vmem>>, vector<8x128xf32>,
    } else {
    }
    return
  }
  func.func @transform_0(%arg0: i32, %arg1: i32) -> (i32, i32) {
    %c1_i32 = arith.constant 1 : i32
    %0 = arith.muli %arg0, %c1_i32 : i32
    %1 = arith.addi %0, %arg1 : i32
    %c0_i32 = arith.constant 0 : i32
    %c0_i32_0 = arith.constant 0 : i32
    return %1, %c0_i32 : i32, i32
  }
  func.func @transform_1(%arg0: i32, %arg1: i32) -> (i32, i32) {
    %c1_i32 = arith.constant 1 : i32
    %0 = arith.muli %arg0, %c1_i32 : i32
    %1 = arith.addi %0, %arg1 : i32
    %c0_i32 = arith.constant 0 : i32
    %c0_i32_0 = arith.constant 0 : i32
    return %1, %c0_i32 : i32, i32
  }
  func.func @transform_2(%arg0: i32, %arg1: i32) -> (i32, i32) {
    %c0_i32 = arith.constant 0 : i32
    %c0_i32_0 = arith.constant 0 : i32
    %c0_i32_1 = arith.constant 0 : i32
    return %c0_i32, %c0_i32_0 : i32, i32
  }
  func.func @transform_3(%arg0: i32, %arg1: i32) -> (i32, i32) {
    %c0_i32 = arith.constant 0 : i32
    %c0_i32_0 = arith.constant 0 : i32
    return %arg0, %c0_i32 : i32, i32
  }
}

</mosaic_0001>

<bundles_post_ra>
// kernel: tpu_custom_call.1
= control target key start
LH: loop header
LB: loop body
LE: loop exit
PB: predicated region body
PF: predicated region fallthrough
CT: control target
= control target key end

     0   :  { %8 = vsyncpa [#allocation4], 0  ;;  %s747_s0 = inlined_call_operand.vmem [shape: f32[32,8], index: 0, kind: input, shape index: {}]   ;;  %s748_s1 = inlined_call_operand.vmem [shape: s32[32,1], index: 1, kind: input, shape index: {}]   ;;  %s749_s2 = inlined_call_operand.vmem [shape: f32[1,8], index: 2, kind: input, shape index: {}]   ;;  %s750_s3 = inlined_call_operand.hbm [shape: f32[16,128], index: 3, kind: output, shape index: {}]  }
   0x1   :  { %10 = vsyncpa [#allocation4 + $0x1], 0  ;;  %s625_s12 = smov 0   ;;  %s627_s13 = smov 0  }
   0x2   :  { %s629_s14 = smov 0   ;;  %s631_s15 = smov 0  }
   0x3   :  { %s633_s16 = smov 0   ;;  %s635_s17 = smov 0  }
   0x4 LB: > { %s434_s18 = sadd.s32 4294967295, %s601_s17   ;;  %s435_s19 = sadd.s32 4294967294, %s601_s17   ;;  %s601_s17 = sphi %s635_s17, %s16_s17   ;;  %s597_s16 = sphi %s633_s16, %s757_s16   ;;  %s593_s15 = sphi %s631_s15, %s756_s15   ;;  %s589_s14 = sphi %s629_s14, %s755_s14   ;;  %s585_s13 = sphi %s627_s13, %s754_s13   ;;  %s581_s12 = sphi %s625_s12, %s753_s12  }
   0x5   : > { %s28_s20 = sadd.s32 1, %s597_s16  ;;  %s112_s21 = sadd.s32 1, %s589_s14 }
   0x6   : > { %p30_p0 = scmp.ge.s32.totalorder %s28_s20, 2  ;;  %p122_p1 = scmp.ne.s32.totalorder %s589_s14, %s585_s13 }
   0x7   : > { %p123_p2 = scmp.eq.s32.totalorder %s434_s18, 1  ;;  %p128_p3 = scmp.ne.s32.totalorder %s585_s13, %s581_s12 }
   0x8   : > { %s759_s20 = smov (%p30_p0, %s28_s20), 0  ;;  %p129_p5 = scmp.eq.s32.totalorder %s435_s19, 1 }
   0x9   : > { %p665_p4 = por %p123_p2, %p122_p1  ;;  %s109_s23 = ssub.s32 %s597_s16, %s759_s20 }
   0xa   : > { %p438_p6 = scmp.ge.s32.totalorder %s601_s17, 1  ;;  %p110_p7 = scmp.eq.s32.totalorder %s109_s23, 0 }
   0xb   : > { %p672_p8 = por %p129_p5, %p128_p3  ;;  %p172_p9 = scmp.lt.s32.totalorder %s601_s17, 3 }
   0xc   : > { %s678_s25 = scalar_select %p110_p7, %s589_s14, %s112_s21  }
   0xd   : > { %p173_p10 = pnand %p438_p6, %p172_p9 }
   0xe   : > { %s440_s26 = sshll.u32 (!%p173_p10), %s593_s15, 1  ;;  %s446_s9 = sshll.u32 (!%p173_p10), %s593_s15, 4 }
   0xf   : > { %176 = sbr.rel (%p173_p10) target bundleno = 491 (0x1eb), region = 32  ;;  %p205_p11 = scmp.lt.s32.totalorder (!%p173_p10), %s440_s26, 3 }
  0x10   : > { %s200_s10 = sand.u32 (!%p173_p10), 1, %s585_s13   ;;  %s450_s18 = sshll.u32 (!%p173_p10), %s593_s15, 3 }
  0x11   : > { %s439_s11 = sshll.u32 (!%p173_p10), %s200_s10, 3  ;;  %s350_s23 = scalar_lea.hbm (!%p173_p10), %s750_s3, %s450_s18 }
  0x12   : > { %s354_s28 = sshll.u32 (!%p173_p10), %s350_s23, 4  ;;  %s543_s7 = scalar_lea.hbm (!%p173_p10), %s750_s3, 16  ;;  %s355_s28 = int_to_ptr.hbm [resolvable:$true] %s354_s28 }
  0x13   : > { %s537_s15 = sshra.s32 (!%p173_p10), %s355_s28, 4  ;;  %s538_s15 = int_to_ptr.hbm [resolvable:$true] %s537_s15 }
  0x14   : > { %v603_v0 = vmov 0   ;;  %s761_s26 = smov (!%p205_p11, %s440_s26), 3  ;;  %vm245_vm0 = vcmask 64512   ;;  %v231_v7 = vlaneseq  ;;  %v604_v11 = vmov 0.0   ;;  %v514_v17 = vld [vmem:[%s749_s2] ss:$0 sm:$0xff]  ;;  %p544_p1 = scmp.lt.s32.totalorder %s538_s15, %s750_s3 }
  0x15   : > { %512 = vset.pattern.permute.xlu1 %v603_v0  ;;  %513 = vset.pattern.permute.xlu0 %v603_v0  ;;  %s441_s27 = sshll.u32 %s761_s26, 3  ;;  %vm223_vm3 = vcmask 7168   ;;  %v296_v35 = vstv %s446_s9  ;;  %s202_s26 = scalar_lea.vmem [#allocation3], %s439_s11 }
  0x16   : > { %s208_s30 = scalar_lea.vmem %s747_s0, %s441_s27  ;;  %s216_s6 = scalar_lea.vmem %s748_s1, %s441_s27  ;;  %v689_v8 = vand.u32 127, %v231_v7  ;;  %225 = vst.msk [vmem:[#allocation2 + $0x8] sm:$0xff] %vm223_vm3, %v604_v11  ;;  %v294_v34 = vshrl.u32 %v231_v7, 7 }
  0x17   : > { %v226_v1 = vld [vmem:[%s208_s30] sm:$0xff]  ;;  %v227_v4 = vld [vmem:[%s208_s30 + $0x8] sm:$0xff]  ;;  %224 = vst.msk [vmem:[#allocation2] sm:$0xff] %vm223_vm3, %v604_v11  ;;  %s352_s27 = sshll.u32 %s202_s26, 4  ;;  %s340_s30 = scalar_lea.sflag [#allocation4], %s200_s10  ;;  %s353_s27 = int_to_ptr.vmem [resolvable:$true] %s352_s27 }
  0x18   : > { %v228_v2 = vld [vmem:[%s216_s6] sm:$0xff]  ;;  %v246_v3 = vsel %vm245_vm0, %v226_v1, -inf  ;;  %v229_v5 = vld [vmem:[%s216_s6 + $0x8] sm:$0xff]  ;;  %v249_v6 = vsel %vm245_vm0, %v227_v4, -inf  ;;  %v297_v39 = vadd.s32 %v296_v35, %v294_v34  ;;  %v295_v40 = vadd.s32 8, %v294_v34  ;;  %s539_s4 = scalar_lea.hbm %s538_s15, 8 }
  0x19   : > { %234 = vperm.xlu1 %512, %v228_v2   ;;  %247 = vmax.xlane.f32.xlu0 %v246_v3  ;;  %vm333_vm6 = vcmp.eq.s32.totalorder %v294_v34, 0  ;;  %vm334_vm7 = vcmp.eq.s32.totalorder %v689_v8, 0  ;;  %p540_p12 = scmp.ne.s32.totalorder %s538_s15, %s539_s4  ;;  %p545_p2 = scmp.lt.s32.totalorder %s543_s7, %s539_s4 }
  0x1a   : > { %vm299_vm4 = vcmp.lt.s32.totalorder %v297_v39, 32  ;;  %v298_v43 = vadd.s32 %v296_v35, %v295_v40  ;;  %vm335_vm8 = vmand %vm333_vm6, %vm334_vm7 }
  0x1b   : > { %v447_v47 = vsel %vm299_vm4, 1.0, %v604_v11  ;;  %p541_p13 = pnand %p540_p12, %p665_p4  ;;  %p546_p3 = por %p545_p2, %p544_p1 }
  0x1c   : > { %vm300_vm5 = vcmp.lt.s32.totalorder %v298_v43, 32 }
  0x1d   : > { %v448_v55 = vsel %vm300_vm5, 1.0, %v604_v11  ;;  %v306_v59 = vld [vmem:[#allocation2 + $0x8] sm:$0xff]  ;;  %p542_p0 = pneg %p541_p13 }
  0x1e   : > { %v305_v51 = vld [vmem:[#allocation2] sm:$0xff] }
  0x1f   : > { %p547_p5 = pnand %p546_p3, %p542_p0 }
  0x21   : > { %237 = vperm.xlu1 %512, %v229_v5   ;;  %250 = vmax.xlane.f32.xlu0 %v249_v6 }
  0x8b   : > { %v235_v9 = vpop.permute.xlu1 %234 }
  0x8c   : > { %vm239_vm1 = vcmp.eq.s32.totalorder %v689_v8, %v235_v9  ;;  %v248_v10 = vpop.xlane.xlu0 %247 }
  0x8d   : > { %v444_v12 = vsel %vm239_vm1, 1.0, %v604_v11  ;;  %v252_v13 = vsub.f32 %v226_v1, %v248_v10 }
  0x8e   : > { %v270_v14 = vmul.f32 %v444_v12, %v226_v1  ;;  %v283_v31 = vmul.f32 %v514_v17, %v444_v12 }
  0x8f   : > { %v254_v15 = vmul.f32 1.442695, %v252_v13 }
  0x90   : > { %v272_v16 = vsel %vm245_vm0, %v270_v14, 0.0  ;;  %v285_v32 = vsel %vm245_vm0, %v283_v31, 0.0 }
  0x91   : > { %273 = vadd.xlane.f32.xlu0 %v272_v16  ;;  %515 = vpow2.f32 %v254_v15 }
  0x93   : > { %v238_v18 = vpop.permute.xlu1 %237 }
  0x94   : > { %vm240_vm2 = vcmp.eq.s32.totalorder %v689_v8, %v238_v18  ;;  %v251_v19 = vpop.xlane.xlu0 %250 }
  0x95   : > { %v445_v20 = vsel %vm240_vm2, 1.0, %v604_v11  ;;  %v253_v21 = vsub.f32 %v227_v4, %v251_v19 }
  0x96   : > { %v271_v22 = vmul.f32 %v445_v20, %v227_v4  ;;  %v284_v23 = vmul.f32 %v514_v17, %v445_v20 }
  0x97   : > { %v516_v24 = vpop.eup %515  ;;  %v256_v25 = vmul.f32 1.442695, %v253_v21 }
  0x98   : > { %v275_v26 = vsel %vm245_vm0, %v271_v22, 0.0  ;;  %v288_v27 = vsel %vm245_vm0, %v284_v23, 0.0  ;;  %v258_v28 = vsel %vm245_vm0, %v516_v24, 0.0 }
  0x99   : > { %276 = vadd.xlane.f32.xlu1 %v275_v26  ;;  %289 = vadd.xlane.f32.xlu0 %v288_v27  ;;  %517 = vpow2.f32 %v256_v25 }
  0x9a   : > { %259 = vadd.xlane.f32.xlu2 %v258_v28 }
  0x9f   : > { %v518_v29 = vpop.eup %517 }
  0xa0   : > { %v261_v30 = vsel %vm245_vm0, %v518_v29, 0.0 }
  0xa2   : > { %262 = vadd.xlane.f32.xlu2 %v261_v30 }
  0xaa   : > { %286 = vadd.xlane.f32.xlu2 %v285_v32 }
 0x104   : > { %v274_v42 = vpop.xlane.xlu0 %273 }
 0x10c   : > { %v277_v52 = vpop.xlane.xlu1 %276  ;;  %v290_v56 = vpop.xlane.xlu0 %289 }
 0x10d   : > { %v260_v33 = vpop.xlane.xlu2 %259 }
 0x10e   : > { %519 = vlog2.f32 %v260_v33 }
 0x114   : > { %v520_v36 = vpop.eup %519 }
 0x115   : > { %v265_v37 = vmul.f32 0.6931472, %v520_v36  ;;  %v263_v38 = vpop.xlane.xlu2 %262 }
 0x116   : > { %521 = vlog2.f32 %v263_v38 }
 0x117   : > { %v268_v41 = vadd.f32 %v265_v37, %v248_v10 }
 0x119   : > { %v278_v45 = vsub.f32 %v268_v41, %v274_v42 }
 0x11c   : > { %v522_v44 = vpop.eup %521 }
 0x11d   : > { %v267_v46 = vmul.f32 0.6931472, %v522_v44  ;;  %v287_v48 = vpop.xlane.xlu2 %286 }
 0x11e   : > { %v307_v49 = vmul.f32 %v287_v48, %v278_v45 }
 0x11f   : > { %v269_v50 = vadd.f32 %v267_v46, %v251_v19 }
 0x120   : > { %v309_v53 = vmul.f32 %v447_v47, %v307_v49 }
 0x121   : > { %v279_v54 = vsub.f32 %v269_v50, %v277_v52 }
 0x122   : > { %v311_v57 = vadd.f32 %v309_v53, %v305_v51 }
 0x123   : > { %v308_v58 = vmul.f32 %v290_v56, %v279_v54 }
 0x124   : > { %314 = vst.msk [vmem:[#allocation2] sm:$0xff] %vm223_vm3, %v311_v57 }
 0x125   : > { %v310_v60 = vmul.f32 %v448_v55, %v308_v58 }
 0x127   : > { %v312_v61 = vadd.f32 %v310_v60, %v306_v59 }
 0x129   : > { %315 = vst.msk [vmem:[#allocation2 + $0x8] sm:$0xff] %vm223_vm3, %v312_v61 }
 0x12b   : > { %v319_v62 = vld [vmem:[#allocation2] sm:$0xff] }
 0x12c   : > { %v321_v0 = vsel %vm223_vm3, %v319_v62, 0.0 }
 0x130   : > { %v320_v63 = vld [vmem:[#allocation2 + $0x8] sm:$0xff] }
 0x131   : > { %v322_v1 = vsel %vm223_vm3, %v320_v63, 0.0 }
 0x132   : > { %v323_v2 = vadd.f32 %v322_v1, %v321_v0 }
 0x134   : > { %324 = vadd.xlane.f32.xlu2 %v323_v2 }
 0x1a7   : > { %v325_v3 = vpop.xlane.xlu2 %324 }
 0x1a8   : > { %v326_v4 = vrot.slane %v325_v3, 4 }
 0x1aa   : > { %v327_v5 = vadd.f32 %v326_v4, %v325_v3 }
 0x1ac   : > { %v328_v6 = vrot.slane %v327_v5, 2 }
 0x1ae   : > { %v329_v7 = vadd.f32 %v328_v6, %v327_v5 }
 0x1b0   : > { %v330_v9 = vrot.slane %v329_v7, 1 }
 0x1b2   : > { %v331_v10 = vadd.f32 %v330_v9, %v329_v7 }
 0x1b4   : > { %453 = vpush %v331_v10 }
 0x1e5   : > { %s454_s29 = spop %453 }
 0x1e6   : > { %v336_v11 = vstv %s454_s29 }
 0x1e7   : > { %v337_v12 = vsel %vm335_vm8, %v336_v11, 0.0 }
 0x1e8   : > { %338 = vst [vmem:[%s202_s26] sm:$0xff] %v337_v12 }
 0x1e9   : > { %550 = shalt.err (!%p547_p5)
}
 0x1ea   : > { %455 = dma.vmem_to_hbm [thread:$0]  (%p665_p4), %s353_s27, 128, %s355_s28, %s340_s30  }
 0x1eb PF: > { %p461_p6 = scmp.ge.s32.totalorder %s601_s17, 2  ;;  %s366_s10 = sand.u32 1, %s581_s12  }
 0x1ec   : > { %s367_s11 = scalar_lea.sflag [#allocation4], %s366_s10 }
 0x1ed   : > { %p458_p7 = pnand %p461_p6, %p672_p8 }
 0x1ef   : > { %p459_p9 = pneg %p458_p7 }
 0x1f1   : > { %576 = dma.done.wait (%p459_p9), %s367_s11, 128  }
 0x1f2   : > { %578 = vsyncadd (%p459_p9), %s367_s11, 4294967168  ;;  %s16_s17 = sadd.s32 1, %s601_s17   ;;  %s753_s12 = smov %s585_s13 }
 0x1f3   : > { %p13_p10 = scmp.ge.s32.totalorder %s16_s17, 4   ;;  %s754_s13 = smov %s589_s14 }
 0x1f4   : > { %s755_s14 = smov %s678_s25  ;;  %s756_s15 = smov %s597_s16 }
 0x1f5   : > { %s757_s16 = smov %s759_s20  ;;  %15 = sbr.rel (!%p13_p10) target bundleno = 4 (0x4), region = 78 }
 0x1fa   :  { %373 = vsyncpa [#allocation4], 1 }
 0x1fb   :  { %375 = vsyncpa [#allocation4 + $0x1], 1 }

</bundles_post_ra>
